<compile_context>
chip_gen: v5e
topology: v5e:2x2
jax: 0.10.0
libtpu: 0.0.40
codegen_flags: <defaults>
</compile_context>

<pallas_src>
import jax
import jax.numpy as jnp
import numpy as np
from jax.experimental import pallas as pl
from jax.experimental.pallas import tpu as pltpu


# ----------------------------- Pallas kernel ------------------------------ #
def encoder_gru_kernel(tok_ref,          # SMEM (1,) int32   scalar-prefetched token id
                       gi_ref,           # VMEM (Vp, 3*Hp)   f32  precomputed emb@W_ih^T + b_ih
                       h_ref,            # VMEM (1, Hp)      f32  previous hidden (zero-padded)
                       whh_ref,          # VMEM (Hp, 3*Hp)   bf16 packed hidden->hidden weights
                       bh_ref,           # VMEM (1, 3*Hp)    f32  packed hidden bias
                       out_ref):         # VMEM (1, Hp)      f32  new hidden (padded lanes stay 0)
    Hp = h_ref.shape[-1]
    tok = tok_ref[0]

    # Gather the precomputed input-gate row (exact: pure linear algebra done offline).
    gi = gi_ref[pl.ds(tok, 1), :]                        # (1, 3*Hp) f32
    h = h_ref[...]                                        # (1, Hp)   f32

    # Single MXU matmul, bf16 operands, f32 accumulation (K = Hp = one MXU tile).
    gh = jnp.dot(h.astype(jnp.bfloat16), whh_ref[...],
                 preferred_element_type=jnp.float32) + bh_ref[...]

    # PyTorch GRU gate order (r, z, n); slices are 128-lane aligned.
    r = jax.nn.sigmoid(gi[:, 0:Hp] + gh[:, 0:Hp])
    z = jax.nn.sigmoid(gi[:, Hp:2 * Hp] + gh[:, Hp:2 * Hp])
    n = jnp.tanh(gi[:, 2 * Hp:3 * Hp] + r * gh[:, 2 * Hp:3 * Hp])

    # Padded lanes: gi=gh=0 -> r=z=0.5, n=0, h=0 -> h_new = 0.5*0 + 0.5*0 = 0 (padding preserved).
    out_ref[...] = (1.0 - z) * n + z * h


# --------------------------- Parameter packing ----------------------------- #
def pack_encoder_params(params):
    """One-time re-layout of PyTorch-style GRU params for the kernel.
    Call once at load time; NOT part of the per-token forward path."""
    emb = params["embedding"].astype(jnp.float32)          # (V, Hin)
    w_ih = params["w_ih"].astype(jnp.float32)              # (3*Hout, Hin)
    w_hh = params["w_hh"].astype(jnp.float32)              # (3*Hout, Hout)
    b_ih = params["b_ih"].astype(jnp.float32)              # (3*Hout,)
    b_hh = params["b_hh"].astype(jnp.float32)              # (3*Hout,)

    V, H_in = emb.shape
    H_out = w_hh.shape[1]
    Hp = ((H_out + 127) // 128) * 128                      # lane-dense gate width
    Vp = ((V + 7) // 8) * 8                                # sublane-aligned vocab rows

    # Exact offline precompute of the input-side gate pre-activations.
    gi_full = emb @ w_ih.T + b_ih                          # (V, 3*H_out), f32, exact

    gi_table = jnp.zeros((Vp, 3 * Hp), jnp.float32)
    whh_p = jnp.zeros((Hp, 3 * Hp), jnp.float32)
    bh_p = jnp.zeros((1, 3 * Hp), jnp.float32)
    for g in range(3):                                     # gate order r, z, n
        gi_table = gi_table.at[:V, g * Hp:g * Hp + H_out].set(
            gi_full[:, g * H_out:(g + 1) * H_out])
        whh_p = whh_p.at[:H_out, g * Hp:g * Hp + H_out].set(
            w_hh[g * H_out:(g + 1) * H_out].T)
        bh_p = bh_p.at[0, g * Hp:g * Hp + H_out].set(b_hh[g * H_out:(g + 1) * H_out])

    return {
        "gi_table": gi_table,                              # f32 (exact), 48 KB at these shapes
        "whh_p": whh_p.astype(jnp.bfloat16),               # bf16: MXU-native on v5e/v6e/v7x
        "bh_p": bh_p,                                      # f32 (added post-matmul)
        "num_embeddings": jnp.int32(V),                    # for token-id clamping
    }


# ------------------------------ Wrapper ------------------------------------ #
@jax.jit
def encoder_forward(token_id, hidden, packed):
    """token_id: int32 scalar; hidden: (1, 1, Hout) f32; packed: pack_encoder_params(...).
    Returns (output, hidden), both (1, 1, Hout) f32 — matching the PyTorch module."""
    gi_table = packed["gi_table"]
    whh_p = packed["whh_p"]
    bh_p = packed["bh_p"]
    num_emb = packed["num_embeddings"]

    H_out = hidden.shape[-1]
    Vp, threeHp = gi_table.shape
    Hp = threeHp // 3

    # Clamp token id -> no unchecked OOB gather of the gi_table row.
    tok = jnp.clip(jnp.asarray(token_id, jnp.int32), 0, num_emb - 1).reshape(1)
    # Zero-pad hidden state to the lane-dense width.
    h_pad = jnp.zeros((1, Hp), jnp.float32).at[:, :H_out].set(
        hidden.reshape(1, H_out).astype(jnp.float32))

    # All blocks are full-extent (no (8,128)-rule violations); gi_table (48 KB),
    # whh (96 KB bf16) and biases trivially fit VMEM on every generation, so
    # everything is VMEM-resident for the single grid step.
    grid_spec = pltpu.PrefetchScalarGridSpec(
        num_scalar_prefetch=1,
        grid=(1,),
        in_specs=[
            pl.BlockSpec((Vp, 3 * Hp), lambda i, tok_ref: (0, 0)),   # gi_table (full)
            pl.BlockSpec((1, Hp), lambda i, tok_ref: (0, 0)),        # hidden
            pl.BlockSpec((Hp, 3 * Hp), lambda i, tok_ref: (0, 0)),   # W_hh packed (bf16)
            pl.BlockSpec((1, 3 * Hp), lambda i, tok_ref: (0, 0)),    # b_h packed
        ],
        out_specs=pl.BlockSpec((1, Hp), lambda i, tok_ref: (0, 0)),
    )

    h_new_p = pl.pallas_call(
        encoder_gru_kernel,
        out_shape=jax.ShapeDtypeStruct((1, Hp), jnp.float32),
        grid_spec=grid_spec,
        compiler_params=pltpu.CompilerParams(
            dimension_semantics=("arbitrary",),
            vmem_limit_bytes=32 * 1024 * 1024,   # explicit, portable across v5e/v6e/v7x
        ),
    )(tok, gi_table, h_pad, whh_p, bh_p)

    h_new = h_new_p[:, :H_out].reshape(1, 1, H_out)
    # 1-layer, 1-step GRU: output == new hidden; duplicate outside the kernel.
    return h_new, h_new


# --------------------------- Reference (pure JAX) --------------------------- #
def encoder_forward_ref(token_id, hidden, params):
    H_out = hidden.shape[-1]
    x = params["embedding"][token_id].reshape(1, -1)
    h = hidden.reshape(1, H_out)
    gi = x @ params["w_ih"].T + params["b_ih"]
    gh = h @ params["w_hh"].T + params["b_hh"]
    r = jax.nn.sigmoid(gi[:, :H_out] + gh[:, :H_out])
    z = jax.nn.sigmoid(gi[:, H_out:2 * H_out] + gh[:, H_out:2 * H_out])
    n = jnp.tanh(gi[:, 2 * H_out:] + r * gh[:, 2 * H_out:])
    h_new = (1.0 - z) * n + z * h
    return h_new.reshape(1, 1, H_out), h_new.reshape(1, 1, H_out)


# --------------------------------- Main ------------------------------------- #
if __name__ == "__main__":
    # Small, module-consistent shapes.
    input_size = 29            # vocab (26 letters + SOS/EOS/PAD)
    hidden_size = 32
    n_classes = 4
    latent_dim = 32            # mu/var layers are unused in forward
    H_out = hidden_size + n_classes

    key = jax.random.PRNGKey(0)
    k_emb, k_wih, k_whh, k_bih, k_bhh, k_h = jax.random.split(key, 6)

    params = {
        "embedding": jax.random.normal(k_emb, (input_size, hidden_size), jnp.float32) * 0.1,
        "w_ih": jax.random.normal(k_wih, (3 * H_out, hidden_size), jnp.float32) * 0.1,
        "w_hh": jax.random.normal(k_whh, (3 * H_out, H_out), jnp.float32) * 0.1,
        "b_ih": jax.random.normal(k_bih, (3 * H_out,), jnp.float32) * 0.1,
        "b_hh": jax.random.normal(k_bhh, (3 * H_out,), jnp.float32) * 0.1,
    }
    # TODO(synk): mu/var Linear(H_out -> latent_dim) params exist in __init__ but are
    # never used in forward, so they are intentionally omitted here.

    packed = pack_encoder_params(params)   # one-time pre-pack, outside the hot path
    packed = jax.block_until_ready(packed)

    token_id = jnp.int32(7)                                   # single token index
    hidden0 = jax.random.normal(k_h, (1, 1, H_out), jnp.float32) * 0.1

    out, hid = encoder_forward(token_id, hidden0, packed)
    jax.block_until_ready((out, hid))

    out_ref, hid_ref = encoder_forward_ref(token_id, hidden0, params)
    assert out.shape == (1, 1, H_out) and hid.shape == (1, 1, H_out)
    # Tolerance relaxed to 2e-3 because W_hh / h are cast to bf16 for the MXU matmul.
    np.testing.assert_allclose(np.asarray(out), np.asarray(out_ref), rtol=2e-3, atol=2e-3)
    np.testing.assert_allclose(np.asarray(hid), np.asarray(hid_ref), rtol=2e-3, atol=2e-3)

    print("KERNEL_OK")
</pallas_src>

<mosaic_0001>
module attributes {stable_mosaic.version = 11 : i64} {
  func.func @encoder_gru_kernel(%arg0: i32, %arg1: memref<1xi32, #tpu.memory_space<smem>>, %arg2: memref<32x384xf32, #tpu.memory_space<vmem>>, %arg3: memref<1x128xf32, #tpu.memory_space<vmem>>, %arg4: memref<128x384xbf16, #tpu.memory_space<vmem>>, %arg5: memref<1x384xf32, #tpu.memory_space<vmem>>, %arg6: memref<1x128xf32, #tpu.memory_space<vmem>>) attributes {dimension_semantics = [#tpu.dimension_semantics<arbitrary>], iteration_bounds = array<i64: 1>, scalar_prefetch = 1 : i64, scratch_operands = 0 : i64, tpu.core_type = #tpu.core_type<tc>, window_params = [{pipeline_mode = #tpu.pipeline_mode<synchronous>, transform_indices = @transform_0, window_bounds = array<i64: 32, 384>}, {pipeline_mode = #tpu.pipeline_mode<synchronous>, transform_indices = @transform_1, window_bounds = array<i64: 1, 128>}, {pipeline_mode = #tpu.pipeline_mode<synchronous>, transform_indices = @transform_2, window_bounds = array<i64: 128, 384>}, {pipeline_mode = #tpu.pipeline_mode<synchronous>, transform_indices = @transform_3, window_bounds = array<i64: 1, 384>}, {pipeline_mode = #tpu.pipeline_mode<synchronous>, transform_indices = @transform_4, window_bounds = array<i64: 1, 128>}]} {
    %c0 = arith.constant 0 : index
    %0 = memref.load %arg1[%c0] : memref<1xi32, #tpu.memory_space<smem>>
    %1 = arith.index_cast %0 : i32 to index
    %c0_0 = arith.constant 0 : index
    %2 = vector.load %arg2[%1, %c0_0] : memref<32x384xf32, #tpu.memory_space<vmem>>, vector<1x384xf32>
    %c0_1 = arith.constant 0 : index
    %c0_2 = arith.constant 0 : index
    %3 = vector.load %arg3[%c0_1, %c0_2] : memref<1x128xf32, #tpu.memory_space<vmem>>, vector<1x128xf32>
    %4 = arith.truncf %3 : vector<1x128xf32> to vector<1x128xbf16>
    %c0_3 = arith.constant 0 : index
    %c0_4 = arith.constant 0 : index
    %5 = vector.load %arg4[%c0_3, %c0_4] : memref<128x384xbf16, #tpu.memory_space<vmem>>, vector<128x384xbf16>
    %cst = arith.constant dense<0.000000e+00> : vector<1x384xf32>
    %6 = tpu.matmul %4, %5, %cst {dimension_numbers = #tpu.dot_dimension_numbers<[1], [0], [0], [1], [0, 0, 1, 1], [], []>} : vector<1x128xbf16>, vector<128x384xbf16>, vector<1x384xf32> -> vector<1x384xf32>
    %c0_5 = arith.constant 0 : index
    %c0_6 = arith.constant 0 : index
    %7 = vector.load %arg5[%c0_5, %c0_6] : memref<1x384xf32, #tpu.memory_space<vmem>>, vector<1x384xf32>
    %8 = arith.addf %6, %7 : vector<1x384xf32>
    %9 = vector.extract_strided_slice %2 {offsets = [0, 0], sizes = [1, 128], strides = [1, 1]} : vector<1x384xf32> to vector<1x128xf32>
    %10 = vector.extract_strided_slice %8 {offsets = [0, 0], sizes = [1, 128], strides = [1, 1]} : vector<1x384xf32> to vector<1x128xf32>
    %11 = arith.addf %9, %10 : vector<1x128xf32>
    %12 = arith.negf %11 : vector<1x128xf32>
    %13 = math.exp %12 : vector<1x128xf32>
    %cst_7 = arith.constant 1.000000e+00 : f32
    %14 = vector.broadcast %cst_7 : f32 to vector<1x128xf32>
    %15 = arith.addf %14, %13 : vector<1x128xf32>
    %16 = arith.divf %14, %15 : vector<1x128xf32>
    %17 = vector.extract_strided_slice %2 {offsets = [0, 128], sizes = [1, 128], strides = [1, 1]} : vector<1x384xf32> to vector<1x128xf32>
    %18 = vector.extract_strided_slice %8 {offsets = [0, 128], sizes = [1, 128], strides = [1, 1]} : vector<1x384xf32> to vector<1x128xf32>
    %19 = arith.addf %17, %18 : vector<1x128xf32>
    %20 = arith.negf %19 : vector<1x128xf32>
    %21 = math.exp %20 : vector<1x128xf32>
    %cst_8 = arith.constant 1.000000e+00 : f32
    %22 = vector.broadcast %cst_8 : f32 to vector<1x128xf32>
    %23 = arith.addf %22, %21 : vector<1x128xf32>
    %24 = arith.divf %22, %23 : vector<1x128xf32>
    %25 = vector.extract_strided_slice %2 {offsets = [0, 256], sizes = [1, 128], strides = [1, 1]} : vector<1x384xf32> to vector<1x128xf32>
    %26 = vector.extract_strided_slice %8 {offsets = [0, 256], sizes = [1, 128], strides = [1, 1]} : vector<1x384xf32> to vector<1x128xf32>
    %27 = arith.mulf %16, %26 : vector<1x128xf32>
    %28 = arith.addf %25, %27 : vector<1x128xf32>
    %29 = math.tanh %28 : vector<1x128xf32>
    %cst_9 = arith.constant 1.000000e+00 : f32
    %30 = vector.broadcast %cst_9 : f32 to vector<1x128xf32>
    %31 = arith.subf %30, %24 : vector<1x128xf32>
    %32 = arith.mulf %31, %29 : vector<1x128xf32>
    %33 = arith.mulf %24, %3 : vector<1x128xf32>
    %34 = arith.addf %32, %33 : vector<1x128xf32>
    %c0_10 = arith.constant 0 : index
    %c0_11 = arith.constant 0 : index
    %35 = vector.load %arg6[%c0_10, %c0_11] : memref<1x128xf32, #tpu.memory_space<vmem>>, vector<1x128xf32>
    tpu.vector_store %arg6[%c0_10, %c0_11], %34 {strides = array<i32>} : memref<1x128xf32, #tpu.memory_space<vmem>>, vector<1x128xf32>,
    return
  }
  func.func @transform_0(%arg0: i32, %arg1: memref<1xi32, #tpu.memory_space<smem>>) -> (i32, i32) {
    %c0_i32 = arith.constant 0 : i32
    %c0_i32_0 = arith.constant 0 : i32
    %c0_i32_1 = arith.constant 0 : i32
    return %c0_i32, %c0_i32_0 : i32, i32
  }
  func.func @transform_1(%arg0: i32, %arg1: memref<1xi32, #tpu.memory_space<smem>>) -> (i32, i32) {
    %c0_i32 = arith.constant 0 : i32
    %c0_i32_0 = arith.constant 0 : i32
    %c0_i32_1 = arith.constant 0 : i32
    return %c0_i32, %c0_i32_0 : i32, i32
  }
  func.func @transform_2(%arg0: i32, %arg1: memref<1xi32, #tpu.memory_space<smem>>) -> (i32, i32) {
    %c0_i32 = arith.constant 0 : i32
    %c0_i32_0 = arith.constant 0 : i32
    %c0_i32_1 = arith.constant 0 : i32
    return %c0_i32, %c0_i32_0 : i32, i32
  }
  func.func @transform_3(%arg0: i32, %arg1: memref<1xi32, #tpu.memory_space<smem>>) -> (i32, i32) {
    %c0_i32 = arith.constant 0 : i32
    %c0_i32_0 = arith.constant 0 : i32
    %c0_i32_1 = arith.constant 0 : i32
    return %c0_i32, %c0_i32_0 : i32, i32
  }
  func.func @transform_4(%arg0: i32, %arg1: memref<1xi32, #tpu.memory_space<smem>>) -> (i32, i32) {
    %c0_i32 = arith.constant 0 : i32
    %c0_i32_0 = arith.constant 0 : i32
    %c0_i32_1 = arith.constant 0 : i32
    return %c0_i32, %c0_i32_0 : i32, i32
  }
}

</mosaic_0001>

<bundles_post_ra>
// kernel: encoder_forward.1
= control target key start
LH: loop header
LB: loop body
LE: loop exit
PB: predicated region body
PF: predicated region fallthrough
CT: control target
= control target key end

     0   :  { %11 = vsyncpa [#allocation5], 0  ;;  %s585_s0 = inlined_call_operand.<no memory space> [shape: s32[1], index: 0, kind: input, shape index: {}]   ;;  %s586_s1 = inlined_call_operand.hbm [shape: f32[32,384], index: 1, kind: input, shape index: {}]   ;;  %s587_s2 = inlined_call_operand.vmem [shape: f32[1,128], index: 2, kind: input, shape index: {}]   ;;  %s588_s3 = inlined_call_operand.hbm [shape: bf16[128,384], index: 3, kind: input, shape index: {}]   ;;  %s589_s4 = inlined_call_operand.vmem [shape: f32[1,384], index: 4, kind: input, shape index: {}]   ;;  %s590_s5 = inlined_call_operand.vmem [shape: f32[1,128], index: 5, kind: output, shape index: {}]  }
   0x1   :  { %s17_s20 = sshll.u32 %s586_s1, 4  ;;  %s18_s20 = int_to_ptr.hbm [resolvable:$true] %s17_s20 }
   0x2   :  { %12 = vsyncpa [#allocation7], 0  ;;  %s523_s21 = smov [#allocation4]   ;;  %s32_s25 = sshll.u32 %s588_s3, 4  ;;  %s33_s25 = int_to_ptr.hbm [resolvable:$true] %s32_s25 }
   0x3   :  { %s19_s22 = sshll.u32 %s523_s21, 4  ;;  %s524_s26 = smov 384   ;;  %s20_s22 = int_to_ptr.vmem [resolvable:$true] %s19_s22 }
   0x4   :  { %s525_s27 = smov 24   ;;  %s526_s28 = smov [#allocation6]  }
   0x5   :  { %25 = dma.hbm_to_vmem [thread:$0]  %s18_s20, 1536, %s20_s22, [#allocation5], %s524_s26, %s524_s26, %s525_s27  }
   0x6   :  { %s34_s29 = sshll.u32 %s526_s28, 4  ;;  %s527_s30 = smov 192   ;;  %s35_s29 = int_to_ptr.vmem [resolvable:$true] %s34_s29 }
   0x7   :  { %s528_s6 = smov 12  }
   0x8   :  { %40 = dma.hbm_to_vmem [thread:$0]  %s33_s25, 3072, %s35_s29, [#allocation7], %s527_s30, %s527_s30, %s528_s6  }
   0x9   :  { %519 = dma.done.wait [#allocation5], 1536  }
   0xa   :  { %520 = vsyncadd [#allocation5], 4294965760 }
   0xb   :  { %521 = dma.done.wait [#allocation7], 3072  }
   0xc   :  { %522 = vsyncadd [#allocation7], 4294964224  ;;  %v419_v0 = vld [vmem:[#allocation6 + $0xa8] sm:$0xf]  ;;  %v453_v1 = vld [vmem:[#allocation6 + $0xb0] sm:$0xf0] }
   0xd   :  { %v452_v2 = vld [vmem:[#allocation6 + $0xac] sm:$0xf]  ;;  %v420_v3 = vor.u32 %v453_v1, %v419_v0  ;;  %v421_v4 = vld [vmem:[#allocation6 + $0xb4] sm:$0xf0]  ;;  %v407_v5 = vld [vmem:[#allocation6 + $0x90] sm:$0xf] }
   0xe   :  { %v450_v6 = vld [vmem:[#allocation6 + $0x98] sm:$0xf0]  ;;  %v424_v7 = vor.u32 %v452_v2, %v421_v4  ;;  %v449_v8 = vld [vmem:[#allocation6 + $0x94] sm:$0xf]  ;;  %v409_v9 = vld [vmem:[#allocation6 + $0x9c] sm:$0xf0] }
   0xf   :  { %231 = vmatpush.bf16.msra.mxu0 %v420_v3  ;;  %v408_v10 = vor.u32 %v450_v6, %v407_v5  ;;  %v412_v11 = vor.u32 %v449_v8, %v409_v9  ;;  %v395_v12 = vld [vmem:[#allocation6 + $0x78] sm:$0xf]  ;;  %v447_v13 = vld [vmem:[#allocation6 + $0x80] sm:$0xf0]  ;;  %v446_v14 = vld [vmem:[#allocation6 + $0x7c] sm:$0xf] }
  0x10   :  { %244 = vmatpush.bf16.msra.mxu1 %v424_v7  ;;  %v397_v15 = vld [vmem:[#allocation6 + $0x84] sm:$0xf0]  ;;  %v427_v16 = vld [vmem:[#allocation6 + $0xb0] sm:$0xf]  ;;  %v396_v17 = vor.u32 %v447_v13, %v395_v12  ;;  %v454_v18 = vld [vmem:[#allocation6 + $0xb8] sm:$0xf0] }
  0x11   :  { %v400_v19 = vor.u32 %v446_v14, %v397_v15  ;;  %v383_v20 = vld [vmem:[#allocation6 + $0x60] sm:$0xf]  ;;  %v444_v21 = vld [vmem:[#allocation6 + $0x68] sm:$0xf0]  ;;  %v428_v22 = vor.u32 %v454_v18, %v427_v16  ;;  %v415_v23 = vld [vmem:[#allocation6 + $0x98] sm:$0xf] }
  0x12   :  { %v443_v24 = vld [vmem:[#allocation6 + $0x64] sm:$0xf]  ;;  %v385_v25 = vld [vmem:[#allocation6 + $0x6c] sm:$0xf0]  ;;  %v384_v28 = vor.u32 %v444_v21, %v383_v20  ;;  %v403_v29 = vld [vmem:[#allocation6 + $0x80] sm:$0xf] }
  0x13   :  { %232 = vmatpush.bf16.msra.mxu0 %v408_v10  ;;  %v451_v26 = vld [vmem:[#allocation6 + $0xa0] sm:$0xf0]  ;;  %257 = vmatpush.bf16.msra.mxu2 %v428_v22  ;;  %v448_v30 = vld [vmem:[#allocation6 + $0x88] sm:$0xf0]  ;;  %v388_v31 = vor.u32 %v443_v24, %v385_v25  ;;  %v371_v32 = vld [vmem:[#allocation6 + $0x48] sm:$0xf] }
  0x14   :  { %245 = vmatpush.bf16.msra.mxu1 %v412_v11  ;;  %v416_v27 = vor.u32 %v451_v26, %v415_v23  ;;  %v441_v33 = vld [vmem:[#allocation6 + $0x50] sm:$0xf0]  ;;  %v440_v34 = vld [vmem:[#allocation6 + $0x4c] sm:$0xf]  ;;  %v373_v35 = vld [vmem:[#allocation6 + $0x54] sm:$0xf0]  ;;  %v404_v36 = vor.u32 %v448_v30, %v403_v29 }
  0x15   :  { %v372_v37 = vor.u32 %v441_v33, %v371_v32  ;;  %v391_v38 = vld [vmem:[#allocation6 + $0x68] sm:$0xf]  ;;  %v445_v39 = vld [vmem:[#allocation6 + $0x70] sm:$0xf0]  ;;  %v376_v40 = vor.u32 %v440_v34, %v373_v35  ;;  %v359_v41 = vld [vmem:[#allocation6 + $0x30] sm:$0xf] }
  0x16   :  { %v438_v42 = vld [vmem:[#allocation6 + $0x38] sm:$0xf0]  ;;  %v437_v43 = vld [vmem:[#allocation6 + $0x34] sm:$0xf]  ;;  %v361_v44 = vld [vmem:[#allocation6 + $0x3c] sm:$0xf0]  ;;  %v392_v45 = vor.u32 %v445_v39, %v391_v38 }
  0x17   :  { %233 = vmatpush.bf16.msra.mxu0 %v396_v17  ;;  %258 = vmatpush.bf16.msra.mxu2 %v416_v27  ;;  %v360_v46 = vor.u32 %v438_v42, %v359_v41  ;;  %v379_v47 = vld [vmem:[#allocation6 + $0x50] sm:$0xf]  ;;  %v442_v48 = vld [vmem:[#allocation6 + $0x58] sm:$0xf0]  ;;  %v364_v49 = vor.u32 %v437_v43, %v361_v44  ;;  %v347_v50 = vld [vmem:[#allocation6 + $0x18] sm:$0xf] }
  0x18   :  { %246 = vmatpush.bf16.msra.mxu1 %v400_v19  ;;  %v435_v51 = vld [vmem:[#allocation6 + $0x20] sm:$0xf0]  ;;  %v434_v52 = vld [vmem:[#allocation6 + $0x1c] sm:$0xf]  ;;  %v349_v53 = vld [vmem:[#allocation6 + $0x24] sm:$0xf0]  ;;  %v380_v54 = vor.u32 %v442_v48, %v379_v47 }
  0x19   :  { %v348_v55 = vor.u32 %v435_v51, %v347_v50  ;;  %v367_v56 = vld [vmem:[#allocation6 + $0x38] sm:$0xf]  ;;  %v439_v57 = vld [vmem:[#allocation6 + $0x40] sm:$0xf0]  ;;  %v352_v58 = vor.u32 %v434_v52, %v349_v53  ;;  %v335_v59 = vld [vmem:[#allocation6] sm:$0xf] }
  0x1a   :  { %v432_v60 = vld [vmem:[#allocation6 + $0x8] sm:$0xf0]  ;;  %v431_v61 = vld [vmem:[#allocation6 + $0x4] sm:$0xf]  ;;  %v337_v62 = vld [vmem:[#allocation6 + $0xc] sm:$0xf0]  ;;  %v368_v63 = vor.u32 %v439_v57, %v367_v56 }
  0x1b   :  { %234 = vmatpush.bf16.msra.mxu0 %v384_v28  ;;  %259 = vmatpush.bf16.msra.mxu2 %v404_v36  ;;  %v336_v0 = vor.u32 %v432_v60, %v335_v59  ;;  %v568_v1 = vld [vmem:[%s587_s2] sm:$0x1]  ;;  %v436_v3 = vld [vmem:[#allocation6 + $0x28] sm:$0xf0]  ;;  %v340_v4 = vor.u32 %v431_v61, %v337_v62  ;;  %v343_v7 = vld [vmem:[#allocation6 + $0x8] sm:$0xf] }
  0x1c   :  { %247 = vmatpush.bf16.msra.mxu1 %v388_v31  ;;  %v355_v2 = vld [vmem:[#allocation6 + $0x20] sm:$0xf]  ;;  %v62_v5 = vpack.c.bf16 %v568_v1, %v568_v1  ;;  %v433_v8 = vld [vmem:[#allocation6 + $0x10] sm:$0xf0]  ;;  %s52_s8 = sshra.s32 %s585_s0, 3  ;;  %s55_s12 = sand.u32 7, %s585_s0 }
  0x1d   :  { %v356_v6 = vor.u32 %v436_v3, %v355_v2  ;;  %v344_v9 = vor.u32 %v433_v8, %v343_v7  ;;  %s332_s9 = smul.u32 24, %s52_s8  ;;  %v95_v10 = vld [vmem:[%s589_s4] sm:$0x7] }
  0x1e   :  { %v225_v12 = vperm.slane %v95_v10, 0  ;;  %v226_v13 = vperm.slane %v95_v10, 1  ;;  %v227_v35 = vperm.slane %v95_v10, 2 }
  0x1f   :  { %235 = vmatpush.bf16.msra.mxu0 %v372_v37  ;;  %260 = vmatpush.bf16.msra.mxu2 %v392_v45  ;;  %s58_s13 = sadd.s32 %s332_s9, %s55_s12 }
  0x20   :  { %248 = vmatpush.bf16.msra.mxu1 %v376_v40  ;;  %s59_s16 = scalar_lea.vmem [#allocation4], %s58_s13 }
  0x21   :  { %v60_v11 = vld [vmem:[%s59_s16] ss:$8 sm:$0x7] }
  0x22   :  { %v291_v15 = vrot.slane %v60_v11, 1 }
  0x23   :  { %236 = vmatpush.bf16.msra.mxu0 %v360_v46  ;;  %261 = vmatpush.bf16.msra.mxu2 %v380_v54  ;;  %v314_v46 = vrot.slane %v60_v11, 2 }
  0x24   :  { %249 = vmatpush.bf16.msra.mxu1 %v364_v49 }
  0x27   :  { %237 = vmatpush.bf16.msra.mxu0 %v348_v55  ;;  %262 = vmatpush.bf16.msra.mxu2 %v368_v63 }
  0x28   :  { %250 = vmatpush.bf16.msra.mxu1 %v352_v58 }
  0x2b   :  { %238 = vmatpush.bf16.msra.mxu0 %v336_v0  ;;  %263 = vmatpush.bf16.msra.mxu2 %v356_v6 }
  0x2c   :  { %251 = vmatpush.bf16.msra.mxu1 %v340_v4 }
  0x2e   :  { %239 = vmatmul.bf16.vlgmr.msra.gmra.mxu0 %v62_v5 }
  0x2f   :  { %252 = vmatmul.bf16.vlgmr.msra.gmra.mxu1 %v62_v5  ;;  %264 = vmatpush.bf16.msra.mxu2 %v344_v9 }
  0x32   :  { %265 = vmatmul.bf16.vlgmr.msra.gmra.mxu2 %v62_v5 }
  0xab   :  { %v240_v14 = vpop.f32.mrf.mxu0 }
  0xac   :  { %v241_v16 = vadd.f32 %v240_v14, %v225_v12  ;;  %v253_v17 = vpop.f32.mrf.mxu1 }
  0xad   :  { %v254_v18 = vadd.f32 %v253_v17, %v226_v13 }
  0xae   :  { %v270_v19 = vadd.f32 %v241_v16, %v60_v11 }
  0xaf   :  { %v293_v20 = vadd.f32 %v291_v15, %v254_v18 }
  0xb0   :  { %v429_v21 = vmul.f32 -1.442695, %v270_v19 }
  0xb1   :  { %v430_v22 = vmul.f32 -1.442695, %v293_v20 }
  0xb2   :  { %461 = vpow2.f32 %v429_v21 }
  0xb3   :  { %463 = vpow2.f32 %v430_v22  ;;  %v242_v23 = vpop.f32.mrf.mxu0 }
  0xb4   :  { %v255_v24 = vpop.f32.mrf.mxu1 }
  0xb5   :  { %v266_v26 = vpop.f32.mrf.mxu2 }
  0xb6   :  { %v267_v42 = vadd.f32 %v266_v26, %v227_v35 }
  0xb8   :  { %v462_v25 = vpop.eup %461 }
  0xb9   :  { %v464_v27 = vpop.eup %463  ;;  %v274_v28 = vadd.f32 1.0, %v462_v25 }
  0xba   :  { %v297_v29 = vadd.f32 1.0, %v464_v27 }
  0xbb   :  { %465 = vrcp.f32 %v274_v28  ;;  %v286_v38 = vand.u32 2147483648, %v274_v28  ;;  %v284_v40 = vand.u32 2147483647, %v274_v28  ;;  %vm280_vm1 = vweird.f32 %v274_v28 }
  0xbc   :  { %467 = vrcp.f32 %v297_v29  ;;  %vm303_vm4 = vweird.f32 %v297_v29  ;;  %v309_v49 = vand.u32 2147483648, %v297_v29  ;;  %v307_v51 = vand.u32 2147483647, %v297_v29 }
  0xbd   :  { %v268_v30 = vpop.f32.mrf.mxu2  ;;  %v287_v44 = vor.u32 1.1754944e-38, %v286_v38  ;;  %vm285_vm3 = vcmp.eq.f32.partialorder %v284_v40, 8.507059e+37 }
  0xbe   :  { %v310_v54 = vor.u32 1.1754944e-38, %v309_v49  ;;  %vm308_vm7 = vcmp.eq.f32.partialorder %v307_v51, 8.507059e+37 }
  0xc1   :  { %v466_v31 = vpop.eup %465 }
  0xc2   :  { %v468_v32 = vpop.eup %467  ;;  %v276_v33 = vmul.f32 %v466_v31, %v274_v28  ;;  %vm281_vm0 = vweird.f32 %v466_v31 }
  0xc3   :  { %v299_v34 = vmul.f32 %v468_v32, %v297_v29  ;;  %vm282_vm2 = vmor %vm280_vm1, %vm281_vm0  ;;  %vm304_vm5 = vweird.f32 %v468_v32 }
  0xc4   :  { %v277_v36 = vsub.f32 1.0, %v276_v33  ;;  %vm305_vm6 = vmor %vm303_vm4, %vm304_vm5 }
  0xc5   :  { %v300_v37 = vsub.f32 1.0, %v299_v34 }
  0xc6   :  { %v278_v39 = vmul.f32 %v466_v31, %v277_v36 }
  0xc7   :  { %v301_v41 = vmul.f32 %v468_v32, %v300_v37 }
  0xc8   :  { %v279_v43 = vadd.f32 %v466_v31, %v278_v39 }
  0xc9   :  { %v302_v48 = vadd.f32 %v468_v32, %v301_v41 }
  0xca   :  { %v283_v45 = vsel %vm282_vm2, %v466_v31, %v279_v43 }
  0xcb   :  { %v288_v47 = vsel %vm285_vm3, %v287_v44, %v283_v45  ;;  %v306_v53 = vsel %vm305_vm6, %v468_v32, %v302_v48 }
  0xcc   :  { %v313_v50 = vmul.f32 %v288_v47, %v267_v42  ;;  %v311_v55 = vsel %vm308_vm7, %v310_v54, %v306_v53 }
  0xcd   :  { %v318_v56 = vsub.f32 1.0, %v311_v55  ;;  %v320_v59 = vmul.f32 %v311_v55, %v568_v1 }
  0xce   :  { %v316_v52 = vadd.f32 %v314_v46, %v313_v50 }
  0xd0   :  { %469 = vtanh.f32 %v316_v52 }
  0xd6   :  { %v470_v57 = vpop.eup %469 }
  0xd7   :  { %v319_v58 = vmul.f32 %v470_v57, %v318_v56 }
  0xd9   :  { %v321_v60 = vadd.f32 %v320_v59, %v319_v58 }
  0xdb   :  { %322 = vst [vmem:[%s590_s5] sm:$0x1] %v321_v60 }
  0xdc   :  { %327 = vsyncpa [#allocation5], 1 }
  0xdd   :  { %328 = vsyncpa [#allocation7], 1 }

</bundles_post_ra>
